<compile_context>
chip_gen: v6e
topology: v6e:2x2x1
jax: 0.10.0
libtpu: 0.0.40
codegen_flags: <defaults>
</compile_context>

<pallas_src>
import functools
from math import ceil

import jax
import jax.numpy as jnp
import numpy as np
from jax import lax
from jax.experimental import pallas as pl
from jax.experimental.pallas import tpu as pltpu


# --------------------------------------------------------------------------- #
# static (trace-time) tile / sizing helpers
# --------------------------------------------------------------------------- #

def _pick_head_block(heads, dim_head):
    """Heads packed per block: lane-dense (multiple of 128) when possible."""
    if heads * dim_head <= 128:
        return heads                       # block last dim == full array last dim
    for hb in range(1, heads + 1):
        if heads % hb == 0 and (hb * dim_head) % 128 == 0:
            return hb                      # 128-lane-aligned head group
    return heads                           # fallback: all heads in one block


def _pick_k_tile(dim):
    for t in (512, 256, 128):
        if dim % t == 0:
            return t
    return dim


def _pick_landmark_chunk(m, l, target_rows=1024):
    """Landmarks per sequence tile of the QKV kernel (tile rows = c * l)."""
    if m * l <= target_rows:
        return m
    cands = [c for c in range(8, m, 8)
             if m % c == 0 and (c * l) % 8 == 0 and c * l <= target_rows]
    return max(cands) if cands else m


def _pick_seq_chunk(n_pad, target=512):
    """Rows per in-kernel chunk of the attn1 / conv streaming loop."""
    if n_pad <= target:
        return n_pad
    best = 0
    for t in range(8, target + 1, 8):
        if n_pad % t == 0:
            best = t
    return best if best else n_pad


def _pick_mm_tile(size, cap, align):
    """Largest divisor of `size` that is <= cap and a multiple of `align`."""
    if size <= cap:
        return size
    best = 0
    t = align
    while t <= cap:
        if size % t == 0:
            best = t
        t += align
    return best if best else size


def _vmem_limit_bytes():
    """Per-generation VMEM scoped limit with headroom (v7x: ~48MiB, v5e/v6e: ~96MiB)."""
    cap = 128 * 1024 * 1024
    try:
        info = pltpu.get_tpu_info()
        cap = int(getattr(info, "vmem_capacity_bytes", cap))
    except Exception:
        pass
    return int(min(cap * 3 // 4, 100 * 1024 * 1024))


# --------------------------------------------------------------------------- #
# kernel 1: fused QKV projection + f32 landmark means
#   grid = (batch, seq_tile, K_tile); x read exactly once; bf16 q/k/v storage
# --------------------------------------------------------------------------- #

def _qkv_proj_kernel(x_ref, wq_ref, wk_ref, wv_ref,
                     q_ref, k_ref, v_ref, ql_ref, kl_ref,
                     qacc, kacc, vacc, *, l, c):
    f32 = jnp.float32
    bf16 = jnp.bfloat16
    kk = pl.program_id(2)
    last = pl.num_programs(2) - 1
    tn = x_ref.shape[1]

    x32 = x_ref[0]                                           # (tn, tk) f32
    xb = x32.astype(bf16)
    # main projections: bf16 MXU operands, f32 accumulation
    q = jnp.dot(xb, wq_ref[...].astype(bf16), preferred_element_type=f32)
    k = jnp.dot(xb, wk_ref[...].astype(bf16), preferred_element_type=f32)
    v = jnp.dot(xb, wv_ref[...].astype(bf16), preferred_element_type=f32)

    # landmark means in full f32 (pinv-sensitive path):
    #   pool@(x@W) == (pool@x)@W, and pool@x is only (c, tk).
    row = lax.broadcasted_iota(jnp.int32, (c, tn), 0)
    col = lax.broadcasted_iota(jnp.int32, (c, tn), 1)
    pool = jnp.where((col >= row * l) & (col < (row + 1) * l),
                     1.0 / l, 0.0).astype(f32)
    xp = jnp.dot(pool, x32, preferred_element_type=f32)       # (c, tk) f32
    qlp = jnp.dot(xp, wq_ref[...], preferred_element_type=f32)
    klp = jnp.dot(xp, wk_ref[...], preferred_element_type=f32)

    @pl.when(kk == 0)
    def _():
        qacc[...] = q
        kacc[...] = k
        vacc[...] = v
        ql_ref[0] = qlp
        kl_ref[0] = klp

    @pl.when(kk > 0)
    def _():
        qacc[...] += q
        kacc[...] += k
        vacc[...] += v
        ql_ref[0] += qlp
        kl_ref[0] += klp

    @pl.when(kk == last)
    def _():
        q_ref[0] = qacc[...].astype(q_ref.dtype)
        k_ref[0] = kacc[...].astype(k_ref.dtype)
        v_ref[0] = vacc[...].astype(v_ref.dtype)


# --------------------------------------------------------------------------- #
# kernel 2: Nystrom attention core (one batch element x one head-group / step)
# --------------------------------------------------------------------------- #

def _nystrom_kernel(scale_ref, q_ref, k_ref, v_ref, ql_ref, kl_ref, wconv_ref,
                    o_ref, vpad_scr, *, m, hb, pinv_iters, ksize, residual, nc):
    f32 = jnp.float32
    bf16 = jnp.bfloat16

    n_pad = q_ref.shape[1]
    hd = q_ref.shape[2]
    d = hd // hb
    pad = ksize // 2
    n_chunks = n_pad // nc

    inv_norm = scale_ref[0]                 # global 1/(max_col*max_row) scalar

    eye = (lax.broadcasted_iota(jnp.int32, (m, m), 0)
           == lax.broadcasted_iota(jnp.int32, (m, m), 1)).astype(f32)

    # ---- phase 1: landmark-side quantities (small: m x m / m x d per head) --
    attn2_list, attn2t_list, av_list = [], [], []
    for i in range(hb):                     # hb is small and static
        cs = i * d
        ql = ql_ref[0, :, cs:cs + d]        # (m, d) f32
        kl = kl_ref[0, :, cs:cs + d]        # (m, d) f32
        k_h = k_ref[0, :, cs:cs + d]        # (n_pad, d) bf16
        v_h = v_ref[0, :, cs:cs + d]        # (n_pad, d) bf16

        sim2 = jnp.einsum('id,jd->ij', ql, kl, preferred_element_type=f32)
        e2 = jnp.exp(sim2 - jnp.max(sim2, axis=-1, keepdims=True))
        attn2 = e2 / jnp.sum(e2, axis=-1, keepdims=True)   # exact: feeds pinv

        sim3 = jnp.einsum('md,nd->mn', ql.astype(bf16), k_h,
                          preferred_element_type=f32)
        e3 = jnp.exp(sim3 - jnp.max(sim3, axis=-1, keepdims=True))
        attn3 = e3 * pl.reciprocal(jnp.sum(e3, axis=-1, keepdims=True),
                                   approx=True)
        av = jnp.dot(attn3.astype(bf16), v_h, preferred_element_type=f32)  # (m,d)

        attn2_list.append(attn2)
        attn2t_list.append(attn2.T)
        av_list.append(av)

    attn2_s = jnp.stack(attn2_list)                        # (hb, m, m) f32
    z = jnp.stack(attn2t_list) * inv_norm                  # (hb, m, m) f32
    av_s = jnp.stack(av_list)                              # (hb, m, d) f32

    # ---- batched Moore-Penrose iterations across hb independent chains -----
    for _ in range(pinv_iters):
        xz = jnp.einsum('hij,hjk->hik', attn2_s, z, preferred_element_type=f32)
        y = 7.0 * eye - xz
        y = 15.0 * eye - jnp.einsum('hij,hjk->hik', xz, y,
                                    preferred_element_type=f32)
        y = 13.0 * eye - jnp.einsum('hij,hjk->hik', xz, y,
                                    preferred_element_type=f32)
        z = 0.25 * jnp.einsum('hij,hjk->hik', z, y, preferred_element_type=f32)

    zav = jnp.einsum('hij,hjd->hid', z, av_s, preferred_element_type=f32)
    zav_b = zav.astype(bf16)                               # (hb, m, d)
    kl_b = kl_ref[0].astype(bf16)                          # (m, hd)

    # ---- phase 2: stream attn1 / output / 33-tap residual conv over chunks --
    if residual:
        vpad_scr[0:pad, :] = jnp.zeros((pad, hd), f32)
        vpad_scr[pad:pad + n_pad, :] = v_ref[0].astype(f32)
        vpad_scr[pad + n_pad:pad + n_pad + pad, :] = jnp.zeros((pad, hd), f32)
        wtaps = wconv_ref[0]                               # (ksize, hd) f32

    def chunk_body(ci, carry):
        s = pl.multiple_of(ci * nc, nc)
        q_c = q_ref[0, pl.ds(s, nc), :]                    # (nc, hd) bf16
        outs = []
        for i in range(hb):
            cs = i * d
            sim1 = jnp.einsum('nd,md->nm', q_c[:, cs:cs + d],
                              kl_b[:, cs:cs + d], preferred_element_type=f32)
            e1 = jnp.exp(sim1 - jnp.max(sim1, axis=-1, keepdims=True))
            attn1 = e1 * pl.reciprocal(jnp.sum(e1, axis=-1, keepdims=True),
                                       approx=True)
            outs.append(jnp.dot(attn1.astype(bf16), zav_b[i],
                                preferred_element_type=f32))
        out_c = jnp.concatenate(outs, axis=-1)             # (nc, hd) f32
        if residual:
            for t in range(ksize):                         # static 33-tap unroll
                out_c = out_c + wtaps[t:t + 1, :] * vpad_scr[pl.ds(s + t, nc), :]
        o_ref[0, pl.ds(s, nc), :] = out_c.astype(o_ref.dtype)
        return carry

    lax.fori_loop(0, n_chunks, chunk_body, 0)


# --------------------------------------------------------------------------- #
# kernel 3: tiled matmul (output projection), bf16 operands / f32 accumulation
# --------------------------------------------------------------------------- #

def _matmul_kernel(x_ref, w_ref, o_ref, acc_ref):
    prod = jnp.dot(x_ref[...].astype(jnp.bfloat16),
                   w_ref[...].astype(jnp.bfloat16),
                   preferred_element_type=jnp.float32)

    @pl.when(pl.program_id(2) == 0)
    def _():
        acc_ref[...] = prod

    @pl.when(pl.program_id(2) > 0)
    def _():
        acc_ref[...] += prod

    @pl.when(pl.program_id(2) == pl.num_programs(2) - 1)
    def _():
        o_ref[...] = acc_ref[...].astype(o_ref.dtype)


def pallas_matmul(x, w, *, cap_m=512, cap_n=512, cap_k=512):
    M, K = x.shape
    K2, N = w.shape
    assert K == K2
    tm = _pick_mm_tile(M, cap_m, 8)
    tn = _pick_mm_tile(N, cap_n, 128)
    tk = _pick_mm_tile(K, cap_k, 128)
    return pl.pallas_call(
        _matmul_kernel,
        out_shape=jax.ShapeDtypeStruct((M, N), jnp.float32),
        grid_spec=pltpu.PrefetchScalarGridSpec(
            num_scalar_prefetch=0,
            grid=(M // tm, N // tn, K // tk),
            in_specs=[pl.BlockSpec((tm, tk), lambda i, j, kk: (i, kk)),
                      pl.BlockSpec((tk, tn), lambda i, j, kk: (kk, j))],
            out_specs=pl.BlockSpec((tm, tn), lambda i, j, kk: (i, j)),
            scratch_shapes=[pltpu.VMEM((tm, tn), jnp.float32)]),
        compiler_params=pltpu.CompilerParams(
            dimension_semantics=("parallel", "parallel", "arbitrary"),
            vmem_limit_bytes=_vmem_limit_bytes()),
    )(x, w)


# --------------------------------------------------------------------------- #
# JAX wrapper
# --------------------------------------------------------------------------- #

def nystrom_attention(x, w_qkv, w_out, w_conv, *, heads, dim_head, num_landmarks,
                      pinv_iterations=6, residual=True, residual_conv_kernel=33):
    b, n, dim = x.shape
    m = num_landmarks
    inner = heads * dim_head
    scale = dim_head ** -0.5
    ksize = residual_conv_kernel

    remainder = n % m
    if remainder > 0:
        x = jnp.pad(x, ((0, 0), (m - remainder, 0), (0, 0)))   # front pad (F.pad)
    n_pad = x.shape[1]
    l = ceil(n / m)
    assert n_pad == m * l

    hb = _pick_head_block(heads, dim_head)
    G = heads // hb
    hd = hb * dim_head

    tk = _pick_k_tile(dim)
    kt = dim // tk
    c = _pick_landmark_chunk(m, l)
    tn = c * l
    n_tiles = m // c
    vmem_limit = _vmem_limit_bytes()

    # fold the softmax scale into W_q at trace time (constant fold, no runtime op)
    wq = w_qkv[:, :inner] * scale
    wk = w_qkv[:, inner:2 * inner]
    wv = w_qkv[:, 2 * inner:]

    q_arr, k_arr, v_arr, q_land, k_land = pl.pallas_call(
        functools.partial(_qkv_proj_kernel, l=l, c=c),
        out_shape=[
            jax.ShapeDtypeStruct((b, n_pad, inner), jnp.bfloat16),   # q
            jax.ShapeDtypeStruct((b, n_pad, inner), jnp.bfloat16),   # k
            jax.ShapeDtypeStruct((b, n_pad, inner), jnp.bfloat16),   # v
            jax.ShapeDtypeStruct((b, m, inner), jnp.float32),        # q landmarks
            jax.ShapeDtypeStruct((b, m, inner), jnp.float32),        # k landmarks
        ],
        grid_spec=pltpu.PrefetchScalarGridSpec(
            num_scalar_prefetch=0,
            grid=(b, n_tiles, kt),
            in_specs=[
                pl.BlockSpec((1, tn, tk), lambda bi, si, kk: (bi, si, kk)),
                pl.BlockSpec((tk, inner), lambda bi, si, kk: (kk, 0)),
                pl.BlockSpec((tk, inner), lambda bi, si, kk: (kk, 0)),
                pl.BlockSpec((tk, inner), lambda bi, si, kk: (kk, 0)),
            ],
            out_specs=[
                pl.BlockSpec((1, tn, inner), lambda bi, si, kk: (bi, si, 0)),
                pl.BlockSpec((1, tn, inner), lambda bi, si, kk: (bi, si, 0)),
                pl.BlockSpec((1, tn, inner), lambda bi, si, kk: (bi, si, 0)),
                pl.BlockSpec((1, c, inner), lambda bi, si, kk: (bi, si, 0)),
                pl.BlockSpec((1, c, inner), lambda bi, si, kk: (bi, si, 0)),
            ],
            scratch_shapes=[pltpu.VMEM((tn, inner), jnp.float32)] * 3,
        ),
        compiler_params=pltpu.CompilerParams(
            dimension_semantics=("parallel", "parallel", "arbitrary"),
            vmem_limit_bytes=vmem_limit),
    )(x, wq, wk, wv)

    # Global Moore-Penrose init scale 1/(max row-sum * max col-sum) of attn2
    # over all batch*heads, computed from the tiny landmark tensors only
    # (no HBM re-read of q/k).
    qlh = q_land.reshape(b, m, heads, dim_head)
    klh = k_land.reshape(b, m, heads, dim_head)
    sim2_all = jnp.einsum('bihd,bjhd->bhij', qlh, klh)
    attn2_all = jax.nn.softmax(sim2_all, axis=-1)
    pinv_scale = 1.0 / (jnp.max(jnp.sum(attn2_all, axis=-1)) *
                        jnp.max(jnp.sum(attn2_all, axis=-2)))
    pinv_scale = pinv_scale.reshape(1).astype(jnp.float32)

    # per-group, per-tap conv weight rows: entry [g, t, i*dim_head + j] = w[g*hb+i, t]
    if residual:
        wce = jnp.repeat(w_conv.astype(jnp.float32)[:, :, None], dim_head, axis=2)
        wce = wce.reshape(G, hb, ksize, dim_head).transpose(0, 2, 1, 3)
        wce = wce.reshape(G, ksize, hd)
    else:
        wce = jnp.zeros((G, ksize, hd), jnp.float32)

    pad = ksize // 2
    nc = _pick_seq_chunk(n_pad)

    kernel = functools.partial(
        _nystrom_kernel, m=m, hb=hb, pinv_iters=pinv_iterations,
        ksize=ksize, residual=residual, nc=nc)

    attn_out = pl.pallas_call(
        kernel,
        out_shape=jax.ShapeDtypeStruct((b, n_pad, inner), jnp.bfloat16),
        grid_spec=pltpu.PrefetchScalarGridSpec(
            num_scalar_prefetch=0,
            grid=(b, G),
            in_specs=[
                pl.BlockSpec(memory_space=pltpu.MemorySpace.SMEM),        # pinv scale
                pl.BlockSpec((1, n_pad, hd), lambda bi, g: (bi, 0, g)),   # q (bf16)
                pl.BlockSpec((1, n_pad, hd), lambda bi, g: (bi, 0, g)),   # k (bf16)
                pl.BlockSpec((1, n_pad, hd), lambda bi, g: (bi, 0, g)),   # v (bf16)
                pl.BlockSpec((1, m, hd), lambda bi, g: (bi, 0, g)),       # q landmarks
                pl.BlockSpec((1, m, hd), lambda bi, g: (bi, 0, g)),       # k landmarks
                pl.BlockSpec((1, ksize, hd), lambda bi, g: (g, 0, 0)),    # conv rows
            ],
            out_specs=pl.BlockSpec((1, n_pad, hd), lambda bi, g: (bi, 0, g)),
            scratch_shapes=[pltpu.VMEM((n_pad + 2 * pad, hd), jnp.float32)],
        ),
        compiler_params=pltpu.CompilerParams(
            dimension_semantics=("parallel", "parallel"),
            vmem_limit_bytes=vmem_limit),
    )(pinv_scale, q_arr, k_arr, v_arr, q_land, k_land, wce)

    # output projection (tiled matmul, bf16 operands, f32 accumulation)
    out = pallas_matmul(attn_out.reshape(b * n_pad, inner), w_out)
    out = out.reshape(b, n_pad, dim)
    # TODO(synk): nn.Dropout(p=0.0) is an identity in this forward pass; omitted.
    return out[:, -n:]


# --------------------------------------------------------------------------- #
# pure-JAX reference (matches the PyTorch module, all f32)
# --------------------------------------------------------------------------- #

def nystrom_reference(x, w_qkv, w_out, w_conv, *, heads, dim_head, num_landmarks,
                      pinv_iterations=6, residual=True, residual_conv_kernel=33):
    b, n, dim = x.shape
    m = num_landmarks
    scale = dim_head ** -0.5
    remainder = n % m
    if remainder > 0:
        x = jnp.pad(x, ((0, 0), (m - remainder, 0), (0, 0)))
    n_pad = x.shape[1]
    l = ceil(n / m)

    qkv = x @ w_qkv
    q, k, v = jnp.split(qkv, 3, axis=-1)
    sh = lambda t: jnp.transpose(t.reshape(b, n_pad, heads, dim_head), (0, 2, 1, 3))
    q, k, v = sh(q), sh(k), sh(v)
    q = q * scale
    q_l = q.reshape(b, heads, m, l, dim_head).sum(3) / l
    k_l = k.reshape(b, heads, m, l, dim_head).sum(3) / l
    sim1 = jnp.einsum('bhnd,bhmd->bhnm', q, k_l)
    sim2 = jnp.einsum('bhid,bhjd->bhij', q_l, k_l)
    sim3 = jnp.einsum('bhmd,bhnd->bhmn', q_l, k)
    attn1 = jax.nn.softmax(sim1, -1)
    attn2 = jax.nn.softmax(sim2, -1)
    attn3 = jax.nn.softmax(sim3, -1)
    abs_a = jnp.abs(attn2)
    z = jnp.swapaxes(attn2, -1, -2) / (jnp.max(abs_a.sum(-1)) * jnp.max(abs_a.sum(-2)))
    eye = jnp.eye(m)[None, None]
    for _ in range(pinv_iterations):
        xz = attn2 @ z
        z = 0.25 * z @ (13 * eye - xz @ (15 * eye - xz @ (7 * eye - xz)))
    out = attn1 @ (z @ (attn3 @ v))
    if residual:
        pad = residual_conv_kernel // 2
        vp = jnp.pad(v, ((0, 0), (0, 0), (pad, pad), (0, 0)))
        conv = jnp.zeros_like(out)
        for kk in range(residual_conv_kernel):
            conv = conv + w_conv[:, kk][None, :, None, None] * vp[:, :, kk:kk + n_pad, :]
        out = out + conv
    out = jnp.transpose(out, (0, 2, 1, 3)).reshape(b, n_pad, heads * dim_head)
    out = out @ w_out
    return out[:, -n:]


# --------------------------------------------------------------------------- #
# main
# --------------------------------------------------------------------------- #

if __name__ == "__main__":
    key = jax.random.PRNGKey(0)
    b, n, dim = 2, 10, 32
    heads, dim_head = 4, 8
    num_landmarks = 4
    ksize = 33
    inner = heads * dim_head

    k1, k2, k3, k4 = jax.random.split(key, 4)
    x = jax.random.normal(k1, (b, n, dim), jnp.float32)
    w_qkv = jax.random.normal(k2, (dim, inner * 3), jnp.float32) * (dim ** -0.5)
    w_out = jax.random.normal(k3, (inner, dim), jnp.float32) * (inner ** -0.5)
    w_conv = jax.random.normal(k4, (heads, ksize), jnp.float32) * 0.1

    out = nystrom_attention(
        x, w_qkv, w_out, w_conv, heads=heads, dim_head=dim_head,
        num_landmarks=num_landmarks, pinv_iterations=6, residual=True,
        residual_conv_kernel=ksize)
    out = jax.block_until_ready(out)

    ref = nystrom_reference(
        x, w_qkv, w_out, w_conv, heads=heads, dim_head=dim_head,
        num_landmarks=num_landmarks, pinv_iterations=6, residual=True,
        residual_conv_kernel=ksize)
    ref = jax.block_until_ready(ref)

    assert out.shape == (b, n, dim), out.shape
    # bf16 MXU operands / bf16 q,k,v,attn_out storage (f32 accumulation,
    # f32 landmark+pinv path) vs the pure-f32 reference -> 5e-2 tolerance.
    np.testing.assert_allclose(np.asarray(out), np.asarray(ref), rtol=5e-2, atol=5e-2)
    print("KERNEL_OK")
</pallas_src>

<mosaic_0001>
module attributes {stable_mosaic.version = 11 : i64} {
  func.func @_qkv_proj_kernel(%arg0: i32, %arg1: i32, %arg2: i32, %arg3: memref<1x12x32xf32, #tpu.memory_space<vmem>>, %arg4: memref<32x32xf32, #tpu.memory_space<vmem>>, %arg5: memref<32x32xf32, #tpu.memory_space<vmem>>, %arg6: memref<32x32xf32, #tpu.memory_space<vmem>>, %arg7: memref<1x12x32xbf16, #tpu.memory_space<vmem>>, %arg8: memref<1x12x32xbf16, #tpu.memory_space<vmem>>, %arg9: memref<1x12x32xbf16, #tpu.memory_space<vmem>>, %arg10: memref<1x4x32xf32, #tpu.memory_space<vmem>>, %arg11: memref<1x4x32xf32, #tpu.memory_space<vmem>>, %arg12: memref<12x32xf32, #tpu.memory_space<vmem>>, %arg13: memref<12x32xf32, #tpu.memory_space<vmem>>, %arg14: memref<12x32xf32, #tpu.memory_space<vmem>>) attributes {dimension_semantics = [#tpu.dimension_semantics<parallel>, #tpu.dimension_semantics<parallel>, #tpu.dimension_semantics<arbitrary>], iteration_bounds = array<i64: 2, 1, 1>, scalar_prefetch = 0 : i64, scratch_operands = 3 : i64, tpu.core_type = #tpu.core_type<tc>, window_params = [{transform_indices = @transform_0, window_bounds = array<i64: 1, 12, 32>}, {transform_indices = @transform_1, window_bounds = array<i64: 32, 32>}, {transform_indices = @transform_2, window_bounds = array<i64: 32, 32>}, {transform_indices = @transform_3, window_bounds = array<i64: 32, 32>}, {transform_indices = @transform_4, window_bounds = array<i64: 1, 12, 32>}, {transform_indices = @transform_5, window_bounds = array<i64: 1, 12, 32>}, {transform_indices = @transform_6, window_bounds = array<i64: 1, 12, 32>}, {transform_indices = @transform_7, window_bounds = array<i64: 1, 4, 32>}, {transform_indices = @transform_8, window_bounds = array<i64: 1, 4, 32>}]} {
    %c0 = arith.constant 0 : index
    %c0_0 = arith.constant 0 : index
    %c0_1 = arith.constant 0 : index
    %0 = vector.load %arg3[%c0, %c0_0, %c0_1] : memref<1x12x32xf32, #tpu.memory_space<vmem>>, vector<1x12x32xf32>
    %1 = vector.shape_cast %0 : vector<1x12x32xf32> to vector<12x32xf32>
    %2 = arith.truncf %1 : vector<12x32xf32> to vector<12x32xbf16>
    %c0_2 = arith.constant 0 : index
    %c0_3 = arith.constant 0 : index
    %3 = vector.load %arg4[%c0_2, %c0_3] : memref<32x32xf32, #tpu.memory_space<vmem>>, vector<32x32xf32>
    %4 = arith.truncf %3 : vector<32x32xf32> to vector<32x32xbf16>
    %cst = arith.constant dense<0.000000e+00> : vector<12x32xf32>
    %5 = tpu.matmul %2, %4, %cst {dimension_numbers = #tpu.dot_dimension_numbers<[1], [0], [0], [1], [0, 0, 1, 1], [], []>} : vector<12x32xbf16>, vector<32x32xbf16>, vector<12x32xf32> -> vector<12x32xf32>
    %c0_4 = arith.constant 0 : index
    %c0_5 = arith.constant 0 : index
    %6 = vector.load %arg5[%c0_4, %c0_5] : memref<32x32xf32, #tpu.memory_space<vmem>>, vector<32x32xf32>
    %7 = arith.truncf %6 : vector<32x32xf32> to vector<32x32xbf16>
    %cst_6 = arith.constant dense<0.000000e+00> : vector<12x32xf32>
    %8 = tpu.matmul %2, %7, %cst_6 {dimension_numbers = #tpu.dot_dimension_numbers<[1], [0], [0], [1], [0, 0, 1, 1], [], []>} : vector<12x32xbf16>, vector<32x32xbf16>, vector<12x32xf32> -> vector<12x32xf32>
    %c0_7 = arith.constant 0 : index
    %c0_8 = arith.constant 0 : index
    %9 = vector.load %arg6[%c0_7, %c0_8] : memref<32x32xf32, #tpu.memory_space<vmem>>, vector<32x32xf32>
    %10 = arith.truncf %9 : vector<32x32xf32> to vector<32x32xbf16>
    %cst_9 = arith.constant dense<0.000000e+00> : vector<12x32xf32>
    %11 = tpu.matmul %2, %10, %cst_9 {dimension_numbers = #tpu.dot_dimension_numbers<[1], [0], [0], [1], [0, 0, 1, 1], [], []>} : vector<12x32xbf16>, vector<32x32xbf16>, vector<12x32xf32> -> vector<12x32xf32>
    %12 = tpu.iota {dimensions = array<i32: 0>} : vector<4x12xi32>
    %13 = tpu.iota {dimensions = array<i32: 1>} : vector<4x12xi32>
    %c3_i32 = arith.constant 3 : i32
    %14 = vector.broadcast %c3_i32 : i32 to vector<4x12xi32>
    %15 = arith.muli %12, %14 : vector<4x12xi32>
    %16 = arith.cmpi sge, %13, %15 : vector<4x12xi32>
    %c1_i32 = arith.constant 1 : i32
    %17 = vector.broadcast %c1_i32 : i32 to vector<4x12xi32>
    %18 = arith.addi %12, %17 : vector<4x12xi32>
    %c3_i32_10 = arith.constant 3 : i32
    %19 = vector.broadcast %c3_i32_10 : i32 to vector<4x12xi32>
    %20 = arith.muli %18, %19 : vector<4x12xi32>
    %21 = arith.cmpi slt, %13, %20 : vector<4x12xi32>
    %22 = arith.andi %16, %21 : vector<4x12xi1>
    %cst_11 = arith.constant 0.333333343 : f32
    %cst_12 = arith.constant 0.000000e+00 : f32
    %23 = vector.broadcast %cst_11 : f32 to vector<4x12xf32>
    %24 = vector.broadcast %cst_12 : f32 to vector<4x12xf32>
    %25 = arith.select %22, %23, %24 : vector<4x12xi1>, vector<4x12xf32>
    %cst_13 = arith.constant dense<0.000000e+00> : vector<4x32xf32>
    %26 = tpu.matmul %25, %1, %cst_13 {dimension_numbers = #tpu.dot_dimension_numbers<[1], [0], [0], [1], [0, 0, 1, 1], [], []>} : vector<4x12xf32>, vector<12x32xf32>, vector<4x32xf32> -> vector<4x32xf32>
    %c0_14 = arith.constant 0 : index
    %c0_15 = arith.constant 0 : index
    %27 = vector.load %arg4[%c0_14, %c0_15] : memref<32x32xf32, #tpu.memory_space<vmem>>, vector<32x32xf32>
    %cst_16 = arith.constant dense<0.000000e+00> : vector<4x32xf32>
    %28 = tpu.matmul %26, %27, %cst_16 {dimension_numbers = #tpu.dot_dimension_numbers<[1], [0], [0], [1], [0, 0, 1, 1], [], []>} : vector<4x32xf32>, vector<32x32xf32>, vector<4x32xf32> -> vector<4x32xf32>
    %c0_17 = arith.constant 0 : index
    %c0_18 = arith.constant 0 : index
    %29 = vector.load %arg5[%c0_17, %c0_18] : memref<32x32xf32, #tpu.memory_space<vmem>>, vector<32x32xf32>
    %cst_19 = arith.constant dense<0.000000e+00> : vector<4x32xf32>
    %30 = tpu.matmul %26, %29, %cst_19 {dimension_numbers = #tpu.dot_dimension_numbers<[1], [0], [0], [1], [0, 0, 1, 1], [], []>} : vector<4x32xf32>, vector<32x32xf32>, vector<4x32xf32> -> vector<4x32xf32>
    %c0_i32 = arith.constant 0 : i32
    %31 = arith.cmpi eq, %arg2, %c0_i32 : i32
    %32 = arith.extui %31 : i1 to i32
    %c0_i32_20 = arith.constant 0 : i32
    %33 = arith.cmpi ne, %32, %c0_i32_20 : i32
    scf.if %33 {
      %c0_25 = arith.constant 0 : index
      %c0_26 = arith.constant 0 : index
      %40 = vector.load %arg12[%c0_25, %c0_26] : memref<12x32xf32, #tpu.memory_space<vmem>>, vector<12x32xf32>
      tpu.vector_store %arg12[%c0_25, %c0_26], %5 {strides = array<i32>} : memref<12x32xf32, #tpu.memory_space<vmem>>, vector<12x32xf32>,
      %c0_27 = arith.constant 0 : index
      %c0_28 = arith.constant 0 : index
      %41 = vector.load %arg13[%c0_27, %c0_28] : memref<12x32xf32, #tpu.memory_space<vmem>>, vector<12x32xf32>
      tpu.vector_store %arg13[%c0_27, %c0_28], %8 {strides = array<i32>} : memref<12x32xf32, #tpu.memory_space<vmem>>, vector<12x32xf32>,
      %c0_29 = arith.constant 0 : index
      %c0_30 = arith.constant 0 : index
      %42 = vector.load %arg14[%c0_29, %c0_30] : memref<12x32xf32, #tpu.memory_space<vmem>>, vector<12x32xf32>
      tpu.vector_store %arg14[%c0_29, %c0_30], %11 {strides = array<i32>} : memref<12x32xf32, #tpu.memory_space<vmem>>, vector<12x32xf32>,
      %c0_31 = arith.constant 0 : index
      %c0_32 = arith.constant 0 : index
      %c0_33 = arith.constant 0 : index
      %43 = vector.load %arg10[%c0_31, %c0_32, %c0_33] : memref<1x4x32xf32, #tpu.memory_space<vmem>>, vector<1x4x32xf32>
      %44 = vector.shape_cast %43 : vector<1x4x32xf32> to vector<4x32xf32>
      %45 = vector.shape_cast %28 : vector<4x32xf32> to vector<1x4x32xf32>
      tpu.vector_store %arg10[%c0_31, %c0_32, %c0_33], %45 {strides = array<i32>} : memref<1x4x32xf32, #tpu.memory_space<vmem>>, vector<1x4x32xf32>,
      %c0_34 = arith.constant 0 : index
      %c0_35 = arith.constant 0 : index
      %c0_36 = arith.constant 0 : index
      %46 = vector.load %arg11[%c0_34, %c0_35, %c0_36] : memref<1x4x32xf32, #tpu.memory_space<vmem>>, vector<1x4x32xf32>
      %47 = vector.shape_cast %46 : vector<1x4x32xf32> to vector<4x32xf32>
      %48 = vector.shape_cast %30 : vector<4x32xf32> to vector<1x4x32xf32>
      tpu.vector_store %arg11[%c0_34, %c0_35, %c0_36], %48 {strides = array<i32>} : memref<1x4x32xf32, #tpu.memory_space<vmem>>, vector<1x4x32xf32>,
    } else {
    }
    %c0_i32_21 = arith.constant 0 : i32
    %34 = arith.cmpi sgt, %arg2, %c0_i32_21 : i32
    %35 = arith.extui %34 : i1 to i32
    %c0_i32_22 = arith.constant 0 : i32
    %36 = arith.cmpi ne, %35, %c0_i32_22 : i32
    scf.if %36 {
      %c0_25 = arith.constant 0 : index
      %c0_26 = arith.constant 0 : index
      %40 = vector.load %arg12[%c0_25, %c0_26] : memref<12x32xf32, #tpu.memory_space<vmem>>, vector<12x32xf32>
      %41 = arith.addf %40, %5 : vector<12x32xf32>
      %c0_27 = arith.constant 0 : index
      %c0_28 = arith.constant 0 : index
      %42 = vector.load %arg12[%c0_27, %c0_28] : memref<12x32xf32, #tpu.memory_space<vmem>>, vector<12x32xf32>
      tpu.vector_store %arg12[%c0_27, %c0_28], %41 {strides = array<i32>} : memref<12x32xf32, #tpu.memory_space<vmem>>, vector<12x32xf32>,
      %c0_29 = arith.constant 0 : index
      %c0_30 = arith.constant 0 : index
      %43 = vector.load %arg13[%c0_29, %c0_30] : memref<12x32xf32, #tpu.memory_space<vmem>>, vector<12x32xf32>
      %44 = arith.addf %43, %8 : vector<12x32xf32>
      %c0_31 = arith.constant 0 : index
      %c0_32 = arith.constant 0 : index
      %45 = vector.load %arg13[%c0_31, %c0_32] : memref<12x32xf32, #tpu.memory_space<vmem>>, vector<12x32xf32>
      tpu.vector_store %arg13[%c0_31, %c0_32], %44 {strides = array<i32>} : memref<12x32xf32, #tpu.memory_space<vmem>>, vector<12x32xf32>,
      %c0_33 = arith.constant 0 : index
      %c0_34 = arith.constant 0 : index
      %46 = vector.load %arg14[%c0_33, %c0_34] : memref<12x32xf32, #tpu.memory_space<vmem>>, vector<12x32xf32>
      %47 = arith.addf %46, %11 : vector<12x32xf32>
      %c0_35 = arith.constant 0 : index
      %c0_36 = arith.constant 0 : index
      %48 = vector.load %arg14[%c0_35, %c0_36] : memref<12x32xf32, #tpu.memory_space<vmem>>, vector<12x32xf32>
      tpu.vector_store %arg14[%c0_35, %c0_36], %47 {strides = array<i32>} : memref<12x32xf32, #tpu.memory_space<vmem>>, vector<12x32xf32>,
      %c0_37 = arith.constant 0 : index
      %c0_38 = arith.constant 0 : index
      %c0_39 = arith.constant 0 : index
      %49 = vector.load %arg10[%c0_37, %c0_38, %c0_39] : memref<1x4x32xf32, #tpu.memory_space<vmem>>, vector<1x4x32xf32>
      %50 = vector.shape_cast %49 : vector<1x4x32xf32> to vector<4x32xf32>
      %51 = arith.addf %50, %28 : vector<4x32xf32>
      %c0_40 = arith.constant 0 : index
      %c0_41 = arith.constant 0 : index
      %c0_42 = arith.constant 0 : index
      %52 = vector.load %arg10[%c0_40, %c0_41, %c0_42] : memref<1x4x32xf32, #tpu.memory_space<vmem>>, vector<1x4x32xf32>
      %53 = vector.shape_cast %52 : vector<1x4x32xf32> to vector<4x32xf32>
      %54 = vector.shape_cast %51 : vector<4x32xf32> to vector<1x4x32xf32>
      tpu.vector_store %arg10[%c0_40, %c0_41, %c0_42], %54 {strides = array<i32>} : memref<1x4x32xf32, #tpu.memory_space<vmem>>, vector<1x4x32xf32>,
      %c0_43 = arith.constant 0 : index
      %c0_44 = arith.constant 0 : index
      %c0_45 = arith.constant 0 : index
      %55 = vector.load %arg11[%c0_43, %c0_44, %c0_45] : memref<1x4x32xf32, #tpu.memory_space<vmem>>, vector<1x4x32xf32>
      %56 = vector.shape_cast %55 : vector<1x4x32xf32> to vector<4x32xf32>
      %57 = arith.addf %56, %30 : vector<4x32xf32>
      %c0_46 = arith.constant 0 : index
      %c0_47 = arith.constant 0 : index
      %c0_48 = arith.constant 0 : index
      %58 = vector.load %arg11[%c0_46, %c0_47, %c0_48] : memref<1x4x32xf32, #tpu.memory_space<vmem>>, vector<1x4x32xf32>
      %59 = vector.shape_cast %58 : vector<1x4x32xf32> to vector<4x32xf32>
      %60 = vector.shape_cast %57 : vector<4x32xf32> to vector<1x4x32xf32>
      tpu.vector_store %arg11[%c0_46, %c0_47, %c0_48], %60 {strides = array<i32>} : memref<1x4x32xf32, #tpu.memory_space<vmem>>, vector<1x4x32xf32>,
    } else {
    }
    %c0_i32_23 = arith.constant 0 : i32
    %37 = arith.cmpi eq, %arg2, %c0_i32_23 : i32
    %38 = arith.extui %37 : i1 to i32
    %c0_i32_24 = arith.constant 0 : i32
    %39 = arith.cmpi ne, %38, %c0_i32_24 : i32
    scf.if %39 {
      %c0_25 = arith.constant 0 : index
      %c0_26 = arith.constant 0 : index
      %40 = vector.load %arg12[%c0_25, %c0_26] : memref<12x32xf32, #tpu.memory_space<vmem>>, vector<12x32xf32>
      %41 = arith.truncf %40 : vector<12x32xf32> to vector<12x32xbf16>
      %c0_27 = arith.constant 0 : index
      %c0_28 = arith.constant 0 : index
      %c0_29 = arith.constant 0 : index
      %42 = vector.load %arg7[%c0_27, %c0_28, %c0_29] : memref<1x12x32xbf16, #tpu.memory_space<vmem>>, vector<1x12x32xbf16>
      %43 = vector.shape_cast %42 : vector<1x12x32xbf16> to vector<12x32xbf16>
      %44 = vector.shape_cast %41 : vector<12x32xbf16> to vector<1x12x32xbf16>
      tpu.vector_store %arg7[%c0_27, %c0_28, %c0_29], %44 {strides = array<i32>} : memref<1x12x32xbf16, #tpu.memory_space<vmem>>, vector<1x12x32xbf16>,
      %c0_30 = arith.constant 0 : index
      %c0_31 = arith.constant 0 : index
      %45 = vector.load %arg13[%c0_30, %c0_31] : memref<12x32xf32, #tpu.memory_space<vmem>>, vector<12x32xf32>
      %46 = arith.truncf %45 : vector<12x32xf32> to vector<12x32xbf16>
      %c0_32 = arith.constant 0 : index
      %c0_33 = arith.constant 0 : index
      %c0_34 = arith.constant 0 : index
      %47 = vector.load %arg8[%c0_32, %c0_33, %c0_34] : memref<1x12x32xbf16, #tpu.memory_space<vmem>>, vector<1x12x32xbf16>
      %48 = vector.shape_cast %47 : vector<1x12x32xbf16> to vector<12x32xbf16>
      %49 = vector.shape_cast %46 : vector<12x32xbf16> to vector<1x12x32xbf16>
      tpu.vector_store %arg8[%c0_32, %c0_33, %c0_34], %49 {strides = array<i32>} : memref<1x12x32xbf16, #tpu.memory_space<vmem>>, vector<1x12x32xbf16>,
      %c0_35 = arith.constant 0 : index
      %c0_36 = arith.constant 0 : index
      %50 = vector.load %arg14[%c0_35, %c0_36] : memref<12x32xf32, #tpu.memory_space<vmem>>, vector<12x32xf32>
      %51 = arith.truncf %50 : vector<12x32xf32> to vector<12x32xbf16>
      %c0_37 = arith.constant 0 : index
      %c0_38 = arith.constant 0 : index
      %c0_39 = arith.constant 0 : index
      %52 = vector.load %arg9[%c0_37, %c0_38, %c0_39] : memref<1x12x32xbf16, #tpu.memory_space<vmem>>, vector<1x12x32xbf16>
      %53 = vector.shape_cast %52 : vector<1x12x32xbf16> to vector<12x32xbf16>
      %54 = vector.shape_cast %51 : vector<12x32xbf16> to vector<1x12x32xbf16>
      tpu.vector_store %arg9[%c0_37, %c0_38, %c0_39], %54 {strides = array<i32>} : memref<1x12x32xbf16, #tpu.memory_space<vmem>>, vector<1x12x32xbf16>,
    } else {
    }
    return
  }
  func.func @transform_0(%arg0: i32, %arg1: i32, %arg2: i32) -> (i32, i32, i32) {
    %c0_i32 = arith.constant 0 : i32
    return %arg0, %arg1, %arg2 : i32, i32, i32
  }
  func.func @transform_1(%arg0: i32, %arg1: i32, %arg2: i32) -> (i32, i32) {
    %c0_i32 = arith.constant 0 : i32
    %c0_i32_0 = arith.constant 0 : i32
    return %arg2, %c0_i32 : i32, i32
  }
  func.func @transform_2(%arg0: i32, %arg1: i32, %arg2: i32) -> (i32, i32) {
    %c0_i32 = arith.constant 0 : i32
    %c0_i32_0 = arith.constant 0 : i32
    return %arg2, %c0_i32 : i32, i32
  }
  func.func @transform_3(%arg0: i32, %arg1: i32, %arg2: i32) -> (i32, i32) {
    %c0_i32 = arith.constant 0 : i32
    %c0_i32_0 = arith.constant 0 : i32
    return %arg2, %c0_i32 : i32, i32
  }
  func.func @transform_4(%arg0: i32, %arg1: i32, %arg2: i32) -> (i32, i32, i32) {
    %c0_i32 = arith.constant 0 : i32
    %c0_i32_0 = arith.constant 0 : i32
    return %arg0, %arg1, %c0_i32 : i32, i32, i32
  }
  func.func @transform_5(%arg0: i32, %arg1: i32, %arg2: i32) -> (i32, i32, i32) {
    %c0_i32 = arith.constant 0 : i32
    %c0_i32_0 = arith.constant 0 : i32
    return %arg0, %arg1, %c0_i32 : i32, i32, i32
  }
  func.func @transform_6(%arg0: i32, %arg1: i32, %arg2: i32) -> (i32, i32, i32) {
    %c0_i32 = arith.constant 0 : i32
    %c0_i32_0 = arith.constant 0 : i32
    return %arg0, %arg1, %c0_i32 : i32, i32, i32
  }
  func.func @transform_7(%arg0: i32, %arg1: i32, %arg2: i32) -> (i32, i32, i32) {
    %c0_i32 = arith.constant 0 : i32
    %c0_i32_0 = arith.constant 0 : i32
    return %arg0, %arg1, %c0_i32 : i32, i32, i32
  }
  func.func @transform_8(%arg0: i32, %arg1: i32, %arg2: i32) -> (i32, i32, i32) {
    %c0_i32 = arith.constant 0 : i32
    %c0_i32_0 = arith.constant 0 : i32
    return %arg0, %arg1, %c0_i32 : i32, i32, i32
  }
}

</mosaic_0001>

<bundles_post_ra>
// kernel: tpu_custom_call.1
= control target key start
LH: loop header
LB: loop body
LE: loop exit
PB: predicated region body
PF: predicated region fallthrough
CT: control target
= control target key end

     0   :  { %s2017_s0 = inlined_call_operand.vmem [shape: f32[2,12,32], index: 0, kind: input, shape index: {}]   ;;  %s2018_s1 = inlined_call_operand.vmem [shape: f32[32,32], index: 1, kind: input, shape index: {}]   ;;  %s2019_s2 = inlined_call_operand.hbm [shape: f32[32,32], index: 2, kind: input, shape index: {}]   ;;  %s2020_s3 = inlined_call_operand.hbm [shape: f32[32,32], index: 3, kind: input, shape index: {}]   ;;  %s2021_s4 = inlined_call_operand.vmem [shape: bf16[2,12,32], index: 4, kind: output, shape index: {0}]   ;;  %s2022_s5 = inlined_call_operand.vmem [shape: bf16[2,12,32], index: 5, kind: output, shape index: {1}]   ;;  %s2023_s6 = inlined_call_operand.vmem [shape: bf16[2,12,32], index: 6, kind: output, shape index: {2}]   ;;  %s2024_s7 = inlined_call_operand.hbm [shape: f32[2,4,32], index: 7, kind: output, shape index: {3}]   ;;  %s2025_s8 = inlined_call_operand.hbm [shape: f32[2,4,32], index: 8, kind: output, shape index: {4}]  }
   0x1   :  { %2027 = sst [smem:[#allocation17_spill]] %s2017_s0 }
   0x2   :  { %2028 = sst [smem:[#allocation18_spill]] %s2018_s1 }
   0x3   :  { %14 = vsyncpa [#allocation6], 0 }
   0x4   :  { %15 = vsyncpa [#allocation9], 0 }
   0x5   :  { %16 = vsyncpa [#allocation7], 0 }
   0x6   :  { %18 = vsyncpa [#allocation7 + $0x1], 0 }
   0x7   :  { %19 = vsyncpa [#allocation12], 0 }
   0x8   :  { %21 = vsyncpa [#allocation12 + $0x1], 0  ;;  %s1736_s27 = smov 0   ;;  %s1738_s28 = smov 0  }
   0x9   :  { %s1740_s29 = smov 0   ;;  %s1742_s30 = smov 0  }
   0xa   :  { %s1744_s9 = smov 0   ;;  %s1746_s10 = smov 0  }
   0xb LB: > { %s1306_s11 = sadd.s32 4294967295, %s1681_s10   ;;  %s1307_s12 = sadd.s32 4294967294, %s1681_s10   ;;  %s1681_s10 = sphi %s1746_s10, %s27_s10   ;;  %s1677_s9 = sphi %s1744_s9, %s2046_s9   ;;  %s1673_s30 = sphi %s1742_s30, %s2045_s30   ;;  %s1669_s29 = sphi %s1740_s29, %s2044_s29   ;;  %s1665_s28 = sphi %s1738_s28, %s2043_s28   ;;  %s1661_s27 = sphi %s1736_s27, %s2042_s27  }
   0xc   : > { %s46_s13 = sadd.s32 1, %s1677_s9  ;;  %s247_s14 = sadd.s32 1, %s1669_s29 }
   0xd   : > { %p48_p0 = scmp.ge.s32.totalorder %s46_s13, 2  ;;  %p257_p1 = scmp.ne.s32.totalorder %s1669_s29, %s1665_s28 }
   0xe   : > { %p258_p2 = scmp.eq.s32.totalorder %s1306_s11, 1  ;;  %p263_p3 = scmp.ne.s32.totalorder %s1665_s28, %s1661_s27 }
   0xf   : > { %s2048_s13 = smov (%p48_p0, %s46_s13), 0  ;;  %p264_p5 = scmp.eq.s32.totalorder %s1307_s12, 1 }
  0x10   : > { %p1776_p4 = por %p258_p2, %p257_p1  ;;  %s242_s16 = ssub.s32 %s1677_s9, %s2048_s13 }
  0x11   : > { %p1308_p6 = scmp.ge.s32.totalorder %s1681_s10, 1  ;;  %p245_p7 = scmp.eq.s32.totalorder %s242_s16, 0 }
  0x12   : > { %s2029_s15 = scalar_select %p1776_p4, 1, 0 }
  0x13   : > { %p1783_p8 = por %p264_p5, %p263_p3  ;;  %p299_p9 = scmp.lt.s32.totalorder %s1681_s10, 3 }
  0x14   : > { %s1789_s18 = scalar_select %p245_p7, %s1669_s29, %s247_s14  }
  0x15   : > { %s2030_s17 = scalar_select %p1783_p8, 1, 0 }
  0x16   : > { %p1791_p10 = pnand %p1308_p6, %p299_p9  ;;  %p1795_p11 = scmp.eq.s32.totalorder %s1306_s11, 0 }
  0x17   : > { %s1683_s21 = smov [#allocation5]   ;;  %s1684_s24 = smov [#allocation8]  }
  0x18   : > { %p1442_p12 = pneg %p1791_p10  ;;  %s323_s22 = sshll.u32 %s1683_s21, 4  ;;  %s324_s22 = int_to_ptr.vmem [resolvable:$true] %s323_s22 }
  0x19   : > { %s339_s25 = sshll.u32 %s1684_s24, 4  ;;  %s1526_s26 = scalar_lea.vmem %s324_s22, 512  ;;  %s340_s25 = int_to_ptr.vmem [resolvable:$true] %s339_s25 }
  0x1a   : > { %p1803_p13 = pnand %p1795_p11, %p1442_p12  ;;  %p1527_p1 = scmp.ne.s32.totalorder %s324_s22, %s1526_s26 }
  0x1b   : > { %p1534_p5 = scmp.lt.s32.totalorder %s324_s22, %s324_s22  ;;  %p1535_p6 = scmp.lt.s32.totalorder %s1526_s26, %s1526_s26 }
  0x1c   : > { %p1517_p0 = pneg %p1803_p13 }
  0x1d   : > { %p1536_p7 = por %p1535_p6, %p1534_p5 }
  0x1e   : > { %p1529_p2 = pnand %p1527_p1, %p1517_p0 }
  0x20   : > { %p1530_p3 = pneg %p1529_p2 }
  0x22   : > { %p1537_p9 = pnand %p1536_p7, %p1530_p3 }
  0x24   : > { %1540 = shalt.err (!%p1537_p9)
}
  0x25   : > { %s1685_s11 = smov 128   ;;  %s1686_s12 = smov 8  }
  0x26   : > { %1445 = dma.hbm_to_vmem [thread:$0]  (!%p1803_p13), %s2019_s2, 512, %s324_s22, [#allocation6], %s1685_s11, %s1685_s11, %s1686_s12  }
  0x27   : > { %s1552_s21 = scalar_lea.vmem %s340_s25, 512  ;;  %p1560_p8 = scmp.lt.s32.totalorder %s340_s25, %s340_s25 }
  0x28   : > { %p1553_p12 = scmp.ne.s32.totalorder %s340_s25, %s1552_s21  ;;  %p1561_p4 = scmp.lt.s32.totalorder %s1552_s21, %s1552_s21 }
  0x2a   : > { %p1555_p1 = pnand %p1553_p12, %p1517_p0  ;;  %p1562_p5 = por %p1561_p4, %p1560_p8 }
  0x2c   : > { %p1556_p2 = pneg %p1555_p1 }
  0x2e   : > { %p1563_p3 = pnand %p1562_p5, %p1556_p2 }
  0x30   : > { %1566 = shalt.err (!%p1563_p3)
}
  0x31   : > { %1448 = dma.hbm_to_vmem [thread:$0]  (!%p1803_p13), %s2020_s3, 512, %s340_s25, [#allocation9], %s1685_s11, %s1685_s11, %s1686_s12  }
  0x32   : > { %371 = sbr.rel (%p1791_p10) target bundleno = 499 (0x1f3), region = 36 }
  0x37   : > { %1644 = dma.done.wait (%p1795_p11), [#allocation6], 512  }
  0x38   : > { %1646 = vsyncadd (%p1795_p11), [#allocation6], 4294966784 }
  0x39   : > { %1648 = dma.done.wait (%p1795_p11), [#allocation9], 512  }
  0x3a   : > { %1650 = vsyncadd (%p1795_p11), [#allocation9], 4294966784  ;;  %p454_p4 = scmp.lt.s32.totalorder %s1673_s30, 1  ;;  %v653_v0 = vlaneseq  ;;  %v1687_v1 = vmov 0.0   ;;  %vm1688_vm0 = vmmov 0   ;;  %s2034_s0 = sld [smem:[#allocation17_spill]] }
  0x3b   : > { %1385 = vmatprep.subr.bf16.mxu1 %v1687_v1  ;;  %1389 = vmatprep.mubr.msk.bf16.mxu1 %vm1688_vm0, %v1687_v1  ;;  %v561_v3 = vld [vmem:[#allocation5 + $0x10] sm:$0xff]  ;;  %v562_v4 = vld [vmem:[#allocation5 + $0x18] sm:$0xff]  ;;  %v1849_v5 = vld [vmem:[#allocation5] sm:$0xff]  ;;  %s2035_s1 = sld [smem:[#allocation18_spill]]  ;;  %vm514_vm1 = vcmask 261120   ;;  %vm668_vm2 = vcmask 1043456  }
  0x3c   : > { %s1840_s19 = scalar_select %p454_p4, %s1673_s30, 1  ;;  %1377 = vmatprep.subr.bf16.mxu0 %v1687_v1  ;;  %1381 = vmatprep.mubr.msk.bf16.mxu0 %vm1688_vm0, %v1687_v1  ;;  %v654_v2 = vshrl.u32 %v653_v0, 7  ;;  %v564_v6 = vpack.c.bf16 %v562_v4, %v561_v3  ;;  %v560_v7 = vld [vmem:[#allocation5 + $0x8] sm:$0xff]  ;;  %v656_v17 = vand.u32 127, %v653_v0  ;;  %v608_v22 = vld [vmem:[#allocation8 + $0x10] sm:$0xff]  ;;  %v609_v23 = vld [vmem:[#allocation8 + $0x18] sm:$0xff] }
  0x3d   : > { %v563_v12 = vpack.c.bf16 %v560_v7, %v1849_v5  ;;  %v611_v26 = vpack.c.bf16 %v609_v23, %v608_v22  ;;  %v606_v27 = vld [vmem:[#allocation8] sm:$0xff]  ;;  %v607_v28 = vld [vmem:[#allocation8 + $0x8] sm:$0xff]  ;;  %vm664_vm6 = vcmask 97280   ;;  %vm890_vm7 = vcmask 257024   ;;  %s1933_s26 = sand.u32 1, %s1665_s28   ;;  %s1341_s23 = sshll.u32 %s1673_s30, 6 }
  0x3e   : > { %s1345_s20 = sshll.u32 %s1840_s19, 4  ;;  %v659_v8 = vadd.s32 1, %v654_v2  ;;  %1386 = vmatpush3.bf16.msra.mxu1 %v564_v6  ;;  %v657_v18 = vmul.u32 3, %v654_v2  ;;  %v610_v29 = vpack.c.bf16 %v607_v28, %v606_v27  ;;  %s1906_s22 = sshll.u32 %s1840_s19, 3  ;;  %vm942_vm8 = vcmask 254976  }
  0x3f   : > { %1387 = vmatprep.subr.bf16.mxu1 %v1687_v1  ;;  %s492_s11 = scalar_lea.vmem %s2022_s5, %s1906_s22  ;;  %s482_s14 = scalar_lea.vmem %s2021_s4, %s1906_s22 }
  0x40   : > { %s464_s25 = scalar_lea.vmem %s2034_s0, %s1345_s20  ;;  %v660_v19 = vmul.u32 3, %v659_v8  ;;  %vm1867_vm3 = vcmp.ge.s32.totalorder %v656_v17, %v657_v18  ;;  %s502_s24 = scalar_lea.vmem %s2023_s6, %s1906_s22 }
  0x41   : > { %v505_v9 = vld [vmem:[%s464_s25] sm:$0xff]  ;;  %v510_v10 = vld [vmem:[%s2035_s1 + $0x10] sm:$0xff]  ;;  %v511_v11 = vld [vmem:[%s2035_s1 + $0x18] sm:$0xff]  ;;  %s1316_s20 = sshll.u32 %s1933_s26, 2  ;;  %s1940_s16 = scalar_lea.hbm %s2024_s7, %s1341_s23 }
  0x42   : > { %v506_v13 = vld [vmem:[%s464_s25 + $0x8] sm:$0xf]  ;;  %v513_v14 = vpack.c.bf16 %v511_v11, %v510_v10  ;;  %v508_v15 = vld [vmem:[%s2035_s1] sm:$0xff]  ;;  %1388 = vmatpush3.bf16.msra.mxu1 %v563_v12  ;;  %vm1871_vm4 = vcmp.lt.s32.totalorder %v656_v17, %v660_v19  ;;  %s445_s25 = scalar_lea.vmem [#allocation10], %s1316_s20  ;;  %s452_s19 = scalar_lea.vmem [#allocation11], %s1316_s20 }
  0x43   : > { %v509_v16 = vld [vmem:[%s2035_s1 + $0x8] sm:$0xff]  ;;  %v507_v21 = vpack.c.bf16 %v506_v13, %v505_v9  ;;  %1401 = vmatprep.subr.mxu1 %v1687_v1  ;;  %vm662_vm5 = vmand %vm1867_vm3, %vm1871_vm4  ;;  %s1041_s12 = sshll.u32 %s452_s19, 4  ;;  %s1947_s30 = scalar_lea.hbm %s2025_s8, %s1341_s23  ;;  %s1949_s12 = int_to_ptr.vmem [resolvable:$true] %s1041_s12 }
  0x44   : > { %1378 = vmatpush3.bf16.msra.mxu0 %v513_v14  ;;  %v512_v20 = vpack.c.bf16 %v509_v16, %v508_v15  ;;  %v663_v30 = vsel %vm662_vm5, 0.33333334, %v1687_v1  ;;  %s996_s20 = scalar_lea.sflag [#allocation7], %s1933_s26  ;;  %p2040_p10 = scmp.ne.s32.totalorder %s2029_s15, 0 }
  0x45   : > { %1379 = vmatprep.subr.bf16.mxu0 %v1687_v1  ;;  %1390 = vmatmul.mubr.msk.bf16.vlgmr.msra.gmra.mxu1 %vm514_vm1, %v507_v21 }
  0x46   : > { %1402 = vmatpush3.msk.msra.mxu1 %vm668_vm2, %v506_v13  ;;  %1405 = vmatprep.mubr.msk.f32.mxu1 %vm1688_vm0, %v1687_v1 }
  0x47   : > { %1403 = vmatprep.subr.mxu1 %v1687_v1 }
  0x48   : > { %1380 = vmatpush3.bf16.msra.mxu0 %v512_v20  ;;  %1404 = vmatpush3.msra.mxu1 %v505_v9 }
  0x49   : > { %1393 = vmatprep.subr.bf16.mxu0 %v1687_v1  ;;  %1419 = vmatprep.subr.mxu1 %v1687_v1 }
  0x4b   : > { %1382 = vmatmul.mubr.msk.bf16.vlgmr.msra.gmra.mxu0 %vm514_vm1, %v507_v21 }
  0x4c   : > { %1394 = vmatpush3.bf16.msra.mxu0 %v611_v26  ;;  %1397 = vmatprep.mubr.msk.bf16.mxu0 %vm1688_vm0, %v1687_v1 }
  0x4d   : > { %1395 = vmatprep.subr.bf16.mxu0 %v1687_v1  ;;  %1406 = vmatmul.mubr.msk.f32.vlgmr.msra.gmra.mxu1 %vm664_vm6, %v663_v30 }
  0x4e   : > { %1420 = vmatpush3.msra.mxu1 %v562_v4  ;;  %1427 = vmatprep.mubr.msk.f32.mxu1 %vm1688_vm0, %v1687_v1 }
  0x4f   : > { %1421 = vmatprep.subr.mxu1 %v1687_v1 }
  0x50   : > { %1396 = vmatpush3.bf16.msra.mxu0 %v610_v29  ;;  %1422 = vmatpush3.msra.mxu1 %v561_v3 }
  0x51   : > { %1408 = vmatprep.subr.mxu0 %v1687_v1  ;;  %1423 = vmatprep.subr.mxu1 %v1687_v1 }
  0x52   : > { %1424 = vmatpush3.msra.mxu1 %v560_v7 }
  0x53   : > { %1398 = vmatmul.mubr.msk.bf16.vlgmr.msra.gmra.mxu0 %vm514_vm1, %v507_v21  ;;  %1425 = vmatprep.subr.mxu1 %v1687_v1 }
  0x54   : > { %1409 = vmatpush3.msra.mxu0 %v511_v11  ;;  %1416 = vmatprep.mubr.msk.f32.mxu0 %vm1688_vm0, %v1687_v1 }
  0x55   : > { %1410 = vmatprep.subr.mxu0 %v1687_v1  ;;  %1426 = vmatpush3.msra.mxu1 %v1849_v5 }
  0x56   : > { %1411 = vmatpush3.msra.mxu0 %v510_v10 }
  0x57   : > { %1412 = vmatprep.subr.mxu0 %v1687_v1 }
  0x58   : > { %1413 = vmatpush3.msra.mxu0 %v509_v16 }
  0x59   : > { %1414 = vmatprep.subr.mxu0 %v1687_v1 }
  0x5a   : > { %1415 = vmatpush3.msra.mxu0 %v508_v15 }
 0x105   : > { %v599_v31 = vpop.f32.mrf.mxu1 }
 0x106   : > { %892 = vst.msk [vmem:[#allocation3] sm:$0xff] %vm514_vm1, %v599_v31 }
 0x107   : > { %v1391_v32 = vpop.f32.mrf.mxu1 }
 0x109   : > { %v602_v34 = vpop.f32.mrf.mxu1 }
 0x10a   : > { %893 = vst.msk [vmem:[#allocation3 + $0x8] sm:$0xf] %vm890_vm7, %v602_v34 }
 0x10b   : > { %v552_v33 = vpop.f32.mrf.mxu0  ;;  %v1392_v36 = vpop.f32.mrf.mxu1 }
 0x10c   : > { %889 = vst.msk [vmem:[#allocation2] sm:$0xff] %vm514_vm1, %v552_v33 }
 0x10d   : > { %v1383_v35 = vpop.f32.mrf.mxu0  ;;  %v944_v38 = vld [vmem:[#allocation3] sm:$0xff]  ;;  %v738_v39 = vpop.f32.mrf.mxu1 }
 0x10e   : > { %v1351_v41 = vpack.c.bf16 %v944_v38, %v944_v38  ;;  %1417 = vmatmul.mubr.msk.f32.vlgmr.msra.gmra.mxu0 %vm514_vm1, %v738_v39  ;;  %1428 = vmatmul.mubr.msk.f32.vlgmr.msra.gmra.mxu1 %vm514_vm1, %v738_v39 }
 0x10f   : > { %v555_v37 = vpop.f32.mrf.mxu0  ;;  %v1407_v42 = vpop.f32.mrf.mxu1 }
 0x110   : > { %891 = vst.msk [vmem:[#allocation2 + $0x8] sm:$0xf] %vm890_vm7, %v555_v37  ;;  %954 = vst.msk [vmem:[%s492_s11] sm:$0xf] %vm890_vm7, %v1351_v41 }
 0x111   : > { %v1384_v40 = vpop.f32.mrf.mxu0  ;;  %v945_v46 = vld [vmem:[#allocation3 + $0x8] sm:$0xf] }
 0x112   : > { %v1352_v48 = vpack.c.bf16 %v945_v46, %v945_v46 }
 0x113   : > { %v930_v43 = vld [vmem:[#allocation2] sm:$0xff]  ;;  %v646_v44 = vpop.f32.mrf.mxu0 }
 0x114   : > { %v1349_v45 = vpack.c.bf16 %v930_v43, %v930_v43  ;;  %894 = vst.msk [vmem:[#allocation4] sm:$0xff] %vm514_vm1, %v646_v44 }
 0x115   : > { %v1399_v47 = vpop.f32.mrf.mxu0  ;;  %955 = vst.msk [vmem:[%s492_s11 + $0x4] sm:$0x3] %vm942_vm8, %v1352_v48  ;;  %s1027_s11 = sshll.u32 %s445_s25, 4  ;;  %s1942_s11 = int_to_ptr.vmem [resolvable:$true] %s1027_s11 }
 0x116   : > { %941 = vst.msk [vmem:[%s482_s14] sm:$0xf] %vm890_vm7, %v1349_v45  ;;  %s1567_s22 = scalar_lea.vmem %s1942_s11, 64 }
 0x117   : > { %v931_v49 = vld [vmem:[#allocation2 + $0x8] sm:$0xf]  ;;  %v649_v50 = vpop.f32.mrf.mxu0  ;;  %p1568_p8 = scmp.ne.s32.totalorder %s1942_s11, %s1567_s22 }
 0x118   : > { %v1350_v51 = vpack.c.bf16 %v931_v49, %v931_v49  ;;  %895 = vst.msk [vmem:[#allocation4 + $0x8] sm:$0xf] %vm890_vm7, %v649_v50 }
 0x119   : > { %v1400_v52 = vpop.f32.mrf.mxu0  ;;  %p1569_p11 = pnand %p1568_p8, %p2040_p10 }
 0x11a   : > { %943 = vst.msk [vmem:[%s482_s14 + $0x4] sm:$0x3] %vm942_vm8, %v1350_v51  ;;  %s1689_s14 = smov [#allocation10]  }
 0x11b   : > { %v956_v53 = vld [vmem:[#allocation4] sm:$0xff]  ;;  %p1570_p13 = pneg %p1569_p11  ;;  %s1571_s0 = sshll.u32 %s1689_s14, 4  ;;  %s1572_s0 = int_to_ptr.vmem [resolvable:$false] %s1571_s0 }
 0x11c   : > { %v1353_v54 = vpack.c.bf16 %v956_v53, %v956_v53  ;;  %s1573_s21 = scalar_lea.vmem %s1572_s0, 128  ;;  %p1574_p0 = scmp.lt.s32.totalorder %s1942_s11, %s1572_s0 }
 0x11d   : > { %p1575_p6 = scmp.lt.s32.totalorder %s1573_s21, %s1567_s22 }
 0x11e   : > { %966 = vst.msk [vmem:[%s502_s24] sm:$0xf] %vm890_vm7, %v1353_v54 }
 0x11f   : > { %v957_v55 = vld [vmem:[#allocation4 + $0x8] sm:$0xf]  ;;  %p1576_p7 = por %p1575_p6, %p1574_p0 }
 0x120   : > { %v1354_v56 = vpack.c.bf16 %v957_v55, %v957_v55 }
 0x121   : > { %p1577_p9 = pnand %p1576_p7, %p1570_p13 }
 0x122   : > { %967 = vst.msk [vmem:[%s502_s24 + $0x4] sm:$0x3] %vm942_vm8, %v1354_v56 }
 0x1ce   : > { %v811_v57 = vpop.f32.mrf.mxu0  ;;  %v881_v58 = vpop.f32.mrf.mxu1 }
 0x1cf   : > { %896 = vst.msk [vmem:[%s445_s25] sm:$0xf] %vm890_vm7, %v811_v57  ;;  %897 = vst.msk [vmem:[%s452_s19] sm:$0xf] %vm890_vm7, %v881_v58 }
 0x1d0   : > { %v1418_v59 = vpop.f32.mrf.mxu0  ;;  %v1429_v60 = vpop.f32.mrf.mxu1 }
 0x1d1   : > { %1580 = shalt.err (!%p1577_p9)
}
 0x1d2   : > { %s1581_s23 = scalar_lea.hbm %s1940_s16, 64  ;;  %s1585_s24 = scalar_lea.hbm %s2024_s7, 128 }
 0x1d3   : > { %p1582_p12 = scmp.ne.s32.totalorder %s1940_s16, %s1581_s23  ;;  %p1586_p5 = scmp.lt.s32.totalorder %s1940_s16, %s2024_s7 }
 0x1d4   : > { %p1587_p3 = scmp.lt.s32.totalorder %s1585_s24, %s1581_s23 }
 0x1d5   : > { %p1583_p1 = pnand %p1582_p12, %p2040_p10 }
 0x1d6   : > { %p1588_p4 = por %p1587_p3, %p1586_p5 }
 0x1d7   : > { %p1584_p2 = pneg %p1583_p1 }
 0x1d9   : > { %p1589_p8 = pnand %p1588_p4, %p1584_p2 }
 0x1db   : > { %1592 = shalt.err (!%p1589_p8)
}
 0x1dc   : > { %1438 = dma.vmem_to_hbm [thread:$0]  (%p2040_p10), %s1942_s11, 64, %s1940_s16, %s996_s20  }
 0x1dd   : > { %s1001_s0 = scalar_lea.sflag [#allocation12], %s1933_s26  ;;  %s1593_s22 = scalar_lea.vmem %s1949_s12, 64 }
 0x1de   : > { %p1594_p11 = scmp.ne.s32.totalorder %s1949_s12, %s1593_s22  ;;  %s1690_s1 = smov [#allocation11]  }
 0x1df   : > { %s1597_s21 = sshll.u32 %s1690_s1, 4  ;;  %s1598_s21 = int_to_ptr.vmem [resolvable:$false] %s1597_s21 }
 0x1e0   : > { %p1595_p13 = pnand %p1594_p11, %p2040_p10  ;;  %s1599_s23 = scalar_lea.vmem %s1598_s21, 128 }
 0x1e1   : > { %p1600_p6 = scmp.lt.s32.totalorder %s1949_s12, %s1598_s21  ;;  %p1601_p7 = scmp.lt.s32.totalorder %s1599_s23, %s1593_s22 }
 0x1e2   : > { %p1596_p0 = pneg %p1595_p13 }
 0x1e3   : > { %p1602_p9 = por %p1601_p7, %p1600_p6 }
 0x1e5   : > { %p1603_p12 = pnand %p1602_p9, %p1596_p0 }
 0x1e7   : > { %1606 = shalt.err (!%p1603_p12)
}
 0x1e8   : > { %s1607_s11 = scalar_lea.hbm %s1947_s30, 64  ;;  %s1611_s20 = scalar_lea.hbm %s2025_s8, 128 }
 0x1e9   : > { %p1608_p1 = scmp.ne.s32.totalorder %s1947_s30, %s1607_s11  ;;  %p1612_p3 = scmp.lt.s32.totalorder %s1947_s30, %s2025_s8 }
 0x1ea   : > { %p1613_p4 = scmp.lt.s32.totalorder %s1611_s20, %s1607_s11 }
 0x1eb   : > { %p1609_p2 = pnand %p1608_p1, %p2040_p10 }
 0x1ec   : > { %p1614_p8 = por %p1613_p4, %p1612_p3 }
 0x1ed   : > { %p1610_p5 = pneg %p1609_p2 }
 0x1ef   : > { %p1615_p11 = pnand %p1614_p8, %p1610_p5 }
 0x1f1   : > { %1618 = shalt.err (!%p1615_p11)
}
 0x1f2   : > { %1439 = dma.vmem_to_hbm [thread:$0]  (%p2040_p10), %s1949_s12, 64, %s1947_s30, %s1001_s0  }
 0x1f3 PF: > { %p1460_p13 = scmp.ge.s32.totalorder %s1681_s10, 2  ;;  %s1089_s24 = sand.u32 1, %s1661_s27  }
 0x1f4   : > { %p2041_p0 = scmp.ne.s32.totalorder %s2030_s17, 0  ;;  %s1090_s14 = scalar_lea.sflag [#allocation7], %s1089_s24 }
 0x1f6   : > { %p1450_p6 = pnand %p1460_p13, %p2041_p0 }
 0x1f8   : > { %p1451_p7 = pneg %p1450_p6 }
 0x1fa   : > { %1652 = dma.done.wait (%p1451_p7), %s1090_s14, 64  }
 0x1fb   : > { %1654 = vsyncadd (%p1451_p7), %s1090_s14, 4294967232  ;;  %s1099_s22 = scalar_lea.sflag [#allocation12], %s1089_s24 }
 0x1fc   : > { %1656 = dma.done.wait (%p1451_p7), %s1099_s22, 64  }
 0x1fd   : > { %1658 = vsyncadd (%p1451_p7), %s1099_s22, 4294967232  ;;  %s27_s10 = sadd.s32 1, %s1681_s10   ;;  %s2042_s27 = smov %s1665_s28 }
 0x1fe   : > { %p24_p9 = scmp.ge.s32.totalorder %s27_s10, 4   ;;  %s2043_s28 = smov %s1669_s29 }
 0x1ff   : > { %s2044_s29 = smov %s1789_s18  ;;  %s2045_s30 = smov %s1677_s9 }
 0x200   : > { %s2046_s9 = smov %s2048_s13  ;;  %26 = sbr.rel (!%p24_p9) target bundleno = 11 (0xb), region = 150 }
 0x205   :  { %1104 = vsyncpa [#allocation6], 1 }
 0x206   :  { %1106 = vsyncpa [#allocation6 + $0x1], 1 }
 0x207   :  { %1107 = vsyncpa [#allocation9], 1 }
 0x208   :  { %1108 = vsyncpa [#allocation7], 1 }
 0x209   :  { %1110 = vsyncpa [#allocation7 + $0x1], 1 }
 0x20a   :  { %1111 = vsyncpa [#allocation12], 1 }
 0x20b   :  { %1113 = vsyncpa [#allocation12 + $0x1], 1 }

</bundles_post_ra>
